<compile_context>
chip_gen: v7x
topology: tpu7x:2x2x1
jax: 0.10.0
libtpu: 0.0.40
codegen_flags: <defaults>
</compile_context>

<pallas_src>
import functools
import random

import jax
import jax.numpy as jnp
from jax.experimental import pallas as pl
from jax.experimental.pallas import tpu as pltpu

LANE = 128        # TPU lane width; pad feature dims up to a multiple of this.
MAX_HIDDEN = 3    # matches random.randint(0, 3) in the PyTorch module


def dynamicnet_kernel(n_ref,                       # scalar prefetch (SMEM)
                      x_ref, w_in_ref, b_in_ref,   # inputs (VMEM)
                      w_h_ref, b_h_ref,
                      w_out_ref, b_out_ref,
                      o_ref,                       # output (VMEM)
                      h_ref):                      # scratch (VMEM)
    # input_linear + clamp(min=0); biases are already broadcast to (N, H_pad).
    h0 = jnp.dot(x_ref[...], w_in_ref[...], preferred_element_type=jnp.float32)
    h_ref[...] = jnp.maximum(h0 + b_in_ref[...], 0.0)

    # "Dynamic" number of hidden layers: statically unrolled to MAX_HIDDEN,
    # each iteration gated at runtime on the SMEM scalar.  Loop-invariant
    # weight/bias loads are hoisted above the guards.
    n = n_ref[0]
    w_h = w_h_ref[...]
    b_h = b_h_ref[...]
    for i in range(MAX_HIDDEN):
        @pl.when(i < n)
        def _():
            hh = jnp.dot(h_ref[...], w_h, preferred_element_type=jnp.float32)
            h_ref[...] = jnp.maximum(hh + b_h, 0.0)

    # output_linear (no activation); padded output lanes stay exactly zero.
    out = jnp.dot(h_ref[...], w_out_ref[...], preferred_element_type=jnp.float32)
    o_ref[...] = (out + b_out_ref[...]).astype(o_ref.dtype)


def _round_up(n, m):
    return ((n + m - 1) // m) * m


def _pad_last(a, target):
    pad = target - a.shape[-1]
    if pad <= 0:
        return a
    return jnp.pad(a, [(0, 0)] * (a.ndim - 1) + [(0, pad)])


def prepare_params(params, n_rows):
    """One-time prep: transpose PyTorch [out, in] weights to [in, out],
    zero-pad lane (last) dims up to a multiple of 128, and pre-broadcast the
    biases to the batch size so in-kernel bias adds are plain VPU adds."""
    H = params["w_in"].shape[0]
    D_out = params["w_out"].shape[0]
    H_pad = _round_up(H, LANE)
    D_out_pad = _round_up(D_out, LANE)

    w_in = _pad_last(params["w_in"].T, H_pad)                      # [D_in, H_pad]
    b_in = _pad_last(params["b_in"][None, :], H_pad)               # [1, H_pad]
    # Pad both dims of the hidden weight; zero rows (padded hidden channels)
    # contribute nothing, zero cols keep padded outputs at zero.
    w_h = _pad_last(params["w_h"].T, H_pad)                        # [H, H_pad]
    w_h = jnp.pad(w_h, [(0, H_pad - H), (0, 0)])                   # [H_pad, H_pad]
    b_h = _pad_last(params["b_h"][None, :], H_pad)                 # [1, H_pad]
    w_out = _pad_last(params["w_out"].T, D_out_pad)                # [H, D_out_pad]
    w_out = jnp.pad(w_out, [(0, H_pad - H), (0, 0)])               # [H_pad, D_out_pad]
    b_out = _pad_last(params["b_out"][None, :], D_out_pad)         # [1, D_out_pad]

    # Pre-broadcast biases to the batch dimension (costs a few KiB of VMEM).
    b_in = jnp.broadcast_to(b_in, (n_rows, H_pad))
    b_h = jnp.broadcast_to(b_h, (n_rows, H_pad))
    b_out = jnp.broadcast_to(b_out, (n_rows, D_out_pad))

    return {
        "w_in": w_in, "b_in": b_in,
        "w_h": w_h, "b_h": b_h,
        "w_out": w_out, "b_out": b_out,
        "d_out": D_out,
    }


@functools.lru_cache(maxsize=None)
def _build_forward(N, D_in, H_pad, D_out_pad, D_out, dtype_name):
    """Build + jit ONE executable for all depths (n_hidden is a runtime SMEM
    scalar, so changing the random depth never triggers a recompile)."""
    dtype = jnp.dtype(dtype_name)

    def const_spec(shape):
        # grid=(1,): index_map gets (grid_idx, *prefetch_refs); always block 0.
        return pl.BlockSpec(shape, lambda i, n_ref: (0,) * len(shape))

    call = pl.pallas_call(
        dynamicnet_kernel,
        out_shape=jax.ShapeDtypeStruct((N, D_out_pad), dtype),
        grid_spec=pltpu.PrefetchScalarGridSpec(
            num_scalar_prefetch=1,
            grid=(1,),
            in_specs=[
                const_spec((N, D_in)),           # x
                const_spec((D_in, H_pad)),       # w_in
                const_spec((N, H_pad)),          # b_in (pre-broadcast)
                const_spec((H_pad, H_pad)),      # w_h
                const_spec((N, H_pad)),          # b_h (pre-broadcast)
                const_spec((H_pad, D_out_pad)),  # w_out
                const_spec((N, D_out_pad)),      # b_out (pre-broadcast)
            ],
            out_specs=const_spec((N, D_out_pad)),
            scratch_shapes=[pltpu.VMEM((N, H_pad), jnp.float32)],  # hidden act
        ),
        compiler_params=pltpu.CompilerParams(
            dimension_semantics=("arbitrary",),
            vmem_limit_bytes=32 << 20,
        ),
    )
    # TODO(synk): when N grows to hundreds of rows, add a "parallel" batch grid
    # axis (per-tile x/out BlockSpecs, constant weight index_maps) to use both
    # v7x TensorCores and actually fill the MXU.

    @jax.jit
    def fwd(n_arr, x, w_in, b_in, w_h, b_h, w_out, b_out):
        out_padded = call(n_arr, x, w_in, b_in, w_h, b_h, w_out, b_out)
        # Lane-slice back to the true D_out — fused into this same executable,
        # so there is no extra host dispatch per forward.
        return out_padded[:, :D_out]

    return fwd


def dynamic_net_forward(x, prepared, n_hidden):
    """x: [N, D_in] float32. prepared: output of prepare_params()."""
    assert 0 <= int(n_hidden) <= MAX_HIDDEN
    N, D_in = x.shape
    H_pad = prepared["w_in"].shape[1]
    D_out_pad = prepared["w_out"].shape[1]

    fwd = _build_forward(N, D_in, H_pad, D_out_pad, prepared["d_out"],
                         str(x.dtype))
    n_arr = jnp.asarray([n_hidden], dtype=jnp.int32)   # runtime scalar -> SMEM
    return fwd(n_arr, x,
               prepared["w_in"], prepared["b_in"],
               prepared["w_h"], prepared["b_h"],
               prepared["w_out"], prepared["b_out"])


def reference_forward(x, params, n_hidden):
    h = jnp.maximum(x @ params["w_in"].T + params["b_in"], 0.0)
    for _ in range(n_hidden):
        h = jnp.maximum(h @ params["w_h"].T + params["b_h"], 0.0)
    return h @ params["w_out"].T + params["b_out"]


if __name__ == "__main__":
    # Small shapes consistent with the module: N x D_in -> H -> ... -> D_out
    N, D_in, H, D_out = 8, 64, 32, 16

    key = jax.random.PRNGKey(0)
    kx, k1, k2, k3, k4, k5, k6 = jax.random.split(key, 7)

    x = jax.random.normal(kx, (N, D_in), dtype=jnp.float32)

    # Deterministic parameter init (PyTorch Linear layout: weight [out, in]).
    params = {
        "w_in":  jax.random.normal(k1, (H, D_in), dtype=jnp.float32) * 0.1,
        "b_in":  jax.random.normal(k2, (H,), dtype=jnp.float32) * 0.1,
        "w_h":   jax.random.normal(k3, (H, H), dtype=jnp.float32) * 0.1,
        "b_h":   jax.random.normal(k4, (H,), dtype=jnp.float32) * 0.1,
        "w_out": jax.random.normal(k5, (D_out, H), dtype=jnp.float32) * 0.1,
        "b_out": jax.random.normal(k6, (D_out,), dtype=jnp.float32) * 0.1,
    }

    # One-time weight transpose + lane padding + bias pre-broadcast.
    prepared = prepare_params(params, N)

    # Validate all 4 possible "dynamic" depths — one compile total, depth is a
    # runtime scalar.
    for depth in range(MAX_HIDDEN + 1):
        out = jax.block_until_ready(dynamic_net_forward(x, prepared, depth))
        ref = reference_forward(x, params, depth)
        assert out.shape == (N, D_out)
        assert jnp.allclose(out, ref, atol=1e-5, rtol=1e-5), f"mismatch at depth {depth}"

    # Mirror the module's per-forward random depth choice (deterministic seed).
    random.seed(0)
    n_hidden = random.randint(0, MAX_HIDDEN)
    out = jax.block_until_ready(dynamic_net_forward(x, prepared, n_hidden))
    ref = reference_forward(x, params, n_hidden)
    assert out.shape == (N, D_out)
    assert jnp.allclose(out, ref, atol=1e-5, rtol=1e-5)

    print("KERNEL_OK")
</pallas_src>

<mosaic_0001>
module attributes {stable_mosaic.version = 11 : i64} {
  func.func @dynamicnet_kernel(%arg0: i32, %arg1: memref<1xi32, #tpu.memory_space<smem>>, %arg2: memref<8x64xf32, #tpu.memory_space<vmem>>, %arg3: memref<64x128xf32, #tpu.memory_space<vmem>>, %arg4: memref<8x128xf32, #tpu.memory_space<vmem>>, %arg5: memref<128x128xf32, #tpu.memory_space<vmem>>, %arg6: memref<8x128xf32, #tpu.memory_space<vmem>>, %arg7: memref<128x128xf32, #tpu.memory_space<vmem>>, %arg8: memref<8x128xf32, #tpu.memory_space<vmem>>, %arg9: memref<8x128xf32, #tpu.memory_space<vmem>>, %arg10: memref<8x128xf32, #tpu.memory_space<vmem>>) attributes {dimension_semantics = [#tpu.dimension_semantics<arbitrary>], iteration_bounds = array<i64: 1>, scalar_prefetch = 1 : i64, scratch_operands = 1 : i64, tpu.core_type = #tpu.core_type<tc>, window_params = [{pipeline_mode = #tpu.pipeline_mode<synchronous>, transform_indices = @transform_0, window_bounds = array<i64: 8, 64>}, {pipeline_mode = #tpu.pipeline_mode<synchronous>, transform_indices = @transform_1, window_bounds = array<i64: 64, 128>}, {pipeline_mode = #tpu.pipeline_mode<synchronous>, transform_indices = @transform_2, window_bounds = array<i64: 8, 128>}, {pipeline_mode = #tpu.pipeline_mode<synchronous>, transform_indices = @transform_3, window_bounds = array<i64: 128, 128>}, {pipeline_mode = #tpu.pipeline_mode<synchronous>, transform_indices = @transform_4, window_bounds = array<i64: 8, 128>}, {pipeline_mode = #tpu.pipeline_mode<synchronous>, transform_indices = @transform_5, window_bounds = array<i64: 128, 128>}, {pipeline_mode = #tpu.pipeline_mode<synchronous>, transform_indices = @transform_6, window_bounds = array<i64: 8, 128>}, {pipeline_mode = #tpu.pipeline_mode<synchronous>, transform_indices = @transform_7, window_bounds = array<i64: 8, 128>}]} {
    %c0 = arith.constant 0 : index
    %c0_0 = arith.constant 0 : index
    %0 = vector.load %arg2[%c0, %c0_0] : memref<8x64xf32, #tpu.memory_space<vmem>>, vector<8x64xf32>
    %c0_1 = arith.constant 0 : index
    %c0_2 = arith.constant 0 : index
    %1 = vector.load %arg3[%c0_1, %c0_2] : memref<64x128xf32, #tpu.memory_space<vmem>>, vector<64x128xf32>
    %cst = arith.constant dense<0.000000e+00> : vector<8x128xf32>
    %2 = tpu.matmul %0, %1, %cst {dimension_numbers = #tpu.dot_dimension_numbers<[1], [0], [0], [1], [0, 0, 1, 1], [], []>} : vector<8x64xf32>, vector<64x128xf32>, vector<8x128xf32> -> vector<8x128xf32>
    %c0_3 = arith.constant 0 : index
    %c0_4 = arith.constant 0 : index
    %3 = vector.load %arg4[%c0_3, %c0_4] : memref<8x128xf32, #tpu.memory_space<vmem>>, vector<8x128xf32>
    %4 = arith.addf %2, %3 : vector<8x128xf32>
    %cst_5 = arith.constant 0.000000e+00 : f32
    %5 = vector.broadcast %cst_5 : f32 to vector<8x128xf32>
    %6 = arith.maximumf %4, %5 : vector<8x128xf32>
    %c0_6 = arith.constant 0 : index
    %c0_7 = arith.constant 0 : index
    %7 = vector.load %arg10[%c0_6, %c0_7] : memref<8x128xf32, #tpu.memory_space<vmem>>, vector<8x128xf32>
    tpu.vector_store %arg10[%c0_6, %c0_7], %6 {strides = array<i32>} : memref<8x128xf32, #tpu.memory_space<vmem>>, vector<8x128xf32>,
    %c0_8 = arith.constant 0 : index
    %8 = memref.load %arg1[%c0_8] : memref<1xi32, #tpu.memory_space<smem>>
    %c0_9 = arith.constant 0 : index
    %c0_10 = arith.constant 0 : index
    %9 = vector.load %arg5[%c0_9, %c0_10] : memref<128x128xf32, #tpu.memory_space<vmem>>, vector<128x128xf32>
    %c0_11 = arith.constant 0 : index
    %c0_12 = arith.constant 0 : index
    %10 = vector.load %arg6[%c0_11, %c0_12] : memref<8x128xf32, #tpu.memory_space<vmem>>, vector<8x128xf32>
    %c0_i32 = arith.constant 0 : i32
    %11 = arith.cmpi sgt, %8, %c0_i32 : i32
    %12 = arith.extui %11 : i1 to i32
    %c0_i32_13 = arith.constant 0 : i32
    %13 = arith.cmpi ne, %12, %c0_i32_13 : i32
    scf.if %13 {
      %c0_25 = arith.constant 0 : index
      %c0_26 = arith.constant 0 : index
      %26 = vector.load %arg10[%c0_25, %c0_26] : memref<8x128xf32, #tpu.memory_space<vmem>>, vector<8x128xf32>
      %cst_27 = arith.constant dense<0.000000e+00> : vector<8x128xf32>
      %27 = tpu.matmul %26, %9, %cst_27 {dimension_numbers = #tpu.dot_dimension_numbers<[1], [0], [0], [1], [0, 0, 1, 1], [], []>} : vector<8x128xf32>, vector<128x128xf32>, vector<8x128xf32> -> vector<8x128xf32>
      %28 = arith.addf %27, %10 : vector<8x128xf32>
      %cst_28 = arith.constant 0.000000e+00 : f32
      %29 = vector.broadcast %cst_28 : f32 to vector<8x128xf32>
      %30 = arith.maximumf %28, %29 : vector<8x128xf32>
      %c0_29 = arith.constant 0 : index
      %c0_30 = arith.constant 0 : index
      %31 = vector.load %arg10[%c0_29, %c0_30] : memref<8x128xf32, #tpu.memory_space<vmem>>, vector<8x128xf32>
      tpu.vector_store %arg10[%c0_29, %c0_30], %30 {strides = array<i32>} : memref<8x128xf32, #tpu.memory_space<vmem>>, vector<8x128xf32>,
    } else {
    }
    %c1_i32 = arith.constant 1 : i32
    %14 = arith.cmpi sgt, %8, %c1_i32 : i32
    %15 = arith.extui %14 : i1 to i32
    %c0_i32_14 = arith.constant 0 : i32
    %16 = arith.cmpi ne, %15, %c0_i32_14 : i32
    scf.if %16 {
      %c0_25 = arith.constant 0 : index
      %c0_26 = arith.constant 0 : index
      %26 = vector.load %arg10[%c0_25, %c0_26] : memref<8x128xf32, #tpu.memory_space<vmem>>, vector<8x128xf32>
      %cst_27 = arith.constant dense<0.000000e+00> : vector<8x128xf32>
      %27 = tpu.matmul %26, %9, %cst_27 {dimension_numbers = #tpu.dot_dimension_numbers<[1], [0], [0], [1], [0, 0, 1, 1], [], []>} : vector<8x128xf32>, vector<128x128xf32>, vector<8x128xf32> -> vector<8x128xf32>
      %28 = arith.addf %27, %10 : vector<8x128xf32>
      %cst_28 = arith.constant 0.000000e+00 : f32
      %29 = vector.broadcast %cst_28 : f32 to vector<8x128xf32>
      %30 = arith.maximumf %28, %29 : vector<8x128xf32>
      %c0_29 = arith.constant 0 : index
      %c0_30 = arith.constant 0 : index
      %31 = vector.load %arg10[%c0_29, %c0_30] : memref<8x128xf32, #tpu.memory_space<vmem>>, vector<8x128xf32>
      tpu.vector_store %arg10[%c0_29, %c0_30], %30 {strides = array<i32>} : memref<8x128xf32, #tpu.memory_space<vmem>>, vector<8x128xf32>,
    } else {
    }
    %c2_i32 = arith.constant 2 : i32
    %17 = arith.cmpi sgt, %8, %c2_i32 : i32
    %18 = arith.extui %17 : i1 to i32
    %c0_i32_15 = arith.constant 0 : i32
    %19 = arith.cmpi ne, %18, %c0_i32_15 : i32
    scf.if %19 {
      %c0_25 = arith.constant 0 : index
      %c0_26 = arith.constant 0 : index
      %26 = vector.load %arg10[%c0_25, %c0_26] : memref<8x128xf32, #tpu.memory_space<vmem>>, vector<8x128xf32>
      %cst_27 = arith.constant dense<0.000000e+00> : vector<8x128xf32>
      %27 = tpu.matmul %26, %9, %cst_27 {dimension_numbers = #tpu.dot_dimension_numbers<[1], [0], [0], [1], [0, 0, 1, 1], [], []>} : vector<8x128xf32>, vector<128x128xf32>, vector<8x128xf32> -> vector<8x128xf32>
      %28 = arith.addf %27, %10 : vector<8x128xf32>
      %cst_28 = arith.constant 0.000000e+00 : f32
      %29 = vector.broadcast %cst_28 : f32 to vector<8x128xf32>
      %30 = arith.maximumf %28, %29 : vector<8x128xf32>
      %c0_29 = arith.constant 0 : index
      %c0_30 = arith.constant 0 : index
      %31 = vector.load %arg10[%c0_29, %c0_30] : memref<8x128xf32, #tpu.memory_space<vmem>>, vector<8x128xf32>
      tpu.vector_store %arg10[%c0_29, %c0_30], %30 {strides = array<i32>} : memref<8x128xf32, #tpu.memory_space<vmem>>, vector<8x128xf32>,
    } else {
    }
    %c0_16 = arith.constant 0 : index
    %c0_17 = arith.constant 0 : index
    %20 = vector.load %arg10[%c0_16, %c0_17] : memref<8x128xf32, #tpu.memory_space<vmem>>, vector<8x128xf32>
    %c0_18 = arith.constant 0 : index
    %c0_19 = arith.constant 0 : index
    %21 = vector.load %arg7[%c0_18, %c0_19] : memref<128x128xf32, #tpu.memory_space<vmem>>, vector<128x128xf32>
    %cst_20 = arith.constant dense<0.000000e+00> : vector<8x128xf32>
    %22 = tpu.matmul %20, %21, %cst_20 {dimension_numbers = #tpu.dot_dimension_numbers<[1], [0], [0], [1], [0, 0, 1, 1], [], []>} : vector<8x128xf32>, vector<128x128xf32>, vector<8x128xf32> -> vector<8x128xf32>
    %c0_21 = arith.constant 0 : index
    %c0_22 = arith.constant 0 : index
    %23 = vector.load %arg8[%c0_21, %c0_22] : memref<8x128xf32, #tpu.memory_space<vmem>>, vector<8x128xf32>
    %24 = arith.addf %22, %23 : vector<8x128xf32>
    %c0_23 = arith.constant 0 : index
    %c0_24 = arith.constant 0 : index
    %25 = vector.load %arg9[%c0_23, %c0_24] : memref<8x128xf32, #tpu.memory_space<vmem>>, vector<8x128xf32>
    tpu.vector_store %arg9[%c0_23, %c0_24], %24 {strides = array<i32>} : memref<8x128xf32, #tpu.memory_space<vmem>>, vector<8x128xf32>,
    return
  }
  func.func @transform_0(%arg0: i32, %arg1: memref<1xi32, #tpu.memory_space<smem>>) -> (i32, i32) {
    %c0_i32 = arith.constant 0 : i32
    %c0_i32_0 = arith.constant 0 : i32
    %c0_i32_1 = arith.constant 0 : i32
    return %c0_i32, %c0_i32_0 : i32, i32
  }
  func.func @transform_1(%arg0: i32, %arg1: memref<1xi32, #tpu.memory_space<smem>>) -> (i32, i32) {
    %c0_i32 = arith.constant 0 : i32
    %c0_i32_0 = arith.constant 0 : i32
    %c0_i32_1 = arith.constant 0 : i32
    return %c0_i32, %c0_i32_0 : i32, i32
  }
  func.func @transform_2(%arg0: i32, %arg1: memref<1xi32, #tpu.memory_space<smem>>) -> (i32, i32) {
    %c0_i32 = arith.constant 0 : i32
    %c0_i32_0 = arith.constant 0 : i32
    %c0_i32_1 = arith.constant 0 : i32
    return %c0_i32, %c0_i32_0 : i32, i32
  }
  func.func @transform_3(%arg0: i32, %arg1: memref<1xi32, #tpu.memory_space<smem>>) -> (i32, i32) {
    %c0_i32 = arith.constant 0 : i32
    %c0_i32_0 = arith.constant 0 : i32
    %c0_i32_1 = arith.constant 0 : i32
    return %c0_i32, %c0_i32_0 : i32, i32
  }
  func.func @transform_4(%arg0: i32, %arg1: memref<1xi32, #tpu.memory_space<smem>>) -> (i32, i32) {
    %c0_i32 = arith.constant 0 : i32
    %c0_i32_0 = arith.constant 0 : i32
    %c0_i32_1 = arith.constant 0 : i32
    return %c0_i32, %c0_i32_0 : i32, i32
  }
  func.func @transform_5(%arg0: i32, %arg1: memref<1xi32, #tpu.memory_space<smem>>) -> (i32, i32) {
    %c0_i32 = arith.constant 0 : i32
    %c0_i32_0 = arith.constant 0 : i32
    %c0_i32_1 = arith.constant 0 : i32
    return %c0_i32, %c0_i32_0 : i32, i32
  }
  func.func @transform_6(%arg0: i32, %arg1: memref<1xi32, #tpu.memory_space<smem>>) -> (i32, i32) {
    %c0_i32 = arith.constant 0 : i32
    %c0_i32_0 = arith.constant 0 : i32
    %c0_i32_1 = arith.constant 0 : i32
    return %c0_i32, %c0_i32_0 : i32, i32
  }
  func.func @transform_7(%arg0: i32, %arg1: memref<1xi32, #tpu.memory_space<smem>>) -> (i32, i32) {
    %c0_i32 = arith.constant 0 : i32
    %c0_i32_0 = arith.constant 0 : i32
    %c0_i32_1 = arith.constant 0 : i32
    return %c0_i32, %c0_i32_0 : i32, i32
  }
}

</mosaic_0001>

<bundles_post_ra>
// kernel: fwd.1
= control target key start
LH: loop header
LB: loop body
LE: loop exit
PB: predicated region body
PF: predicated region fallthrough
CT: control target
= control target key end

     0   :  { %14 = vsyncpa [#allocation6], 0  ;;  %s1260_s0 = inlined_call_operand.<no memory space> [shape: s32[1], index: 0, kind: input, shape index: {}]   ;;  %s1261_s1 = inlined_call_operand.hbm [shape: f32[8,64], index: 1, kind: input, shape index: {}]   ;;  %s1262_s2 = inlined_call_operand.hbm [shape: f32[64,128], index: 2, kind: input, shape index: {}]   ;;  %s1263_s3 = inlined_call_operand.vmem [shape: f32[8,128], index: 3, kind: input, shape index: {}]   ;;  %s1264_s4 = inlined_call_operand.hbm [shape: f32[128,128], index: 4, kind: input, shape index: {}]   ;;  %s1265_s5 = inlined_call_operand.vmem [shape: f32[8,128], index: 5, kind: input, shape index: {}]   ;;  %s1266_s6 = inlined_call_operand.hbm [shape: f32[128,128], index: 6, kind: input, shape index: {}]   ;;  %s1267_s7 = inlined_call_operand.vmem [shape: f32[8,128], index: 7, kind: input, shape index: {}]   ;;  %s1268_s8 = inlined_call_operand.hbm [shape: f32[8,128], index: 8, kind: output, shape index: {}]  }
   0x1   :  { %15 = vsyncpa [#allocation9], 0 }
   0x2   :  { %16 = vsyncpa [#allocation12], 0 }
   0x3   :  { %17 = vsyncpa [#allocation7], 0  ;;  %s1008_s27 = smov [#allocation8]   ;;  %s890_s9 = scalar_lea.hbm %s1262_s2, 1024 }
   0x4   :  { %s33_s28 = sshll.u32 %s1008_s27, 4  ;;  %p891_p0 = scmp.ne.s32.totalorder %s1262_s2, %s890_s9  ;;  %s34_s28 = int_to_ptr.vmem [resolvable:$true] %s33_s28 }
   0x5   :  { %p894_p1 = scmp.lt.u32.totalorder %s890_s9, %s1262_s2 }
   0x7   :  { %p896_p2 = pnand %p894_p1, %p891_p0 }
   0x9   :  { %899 = shalt.err (!%p896_p2)
}
   0xa   :  { %s900_s14 = scalar_lea.vmem %s34_s28, 1024  ;;  %p905_p4 = scmp.lt.s32.totalorder %s34_s28, %s34_s28 }
   0xb   :  { %p901_p3 = scmp.ne.s32.totalorder %s34_s28, %s900_s14  ;;  %p906_p5 = scmp.lt.s32.totalorder %s900_s14, %s900_s14 }
   0xd   :  { %p907_p6 = por %p906_p5, %p905_p4 }
   0xf   :  { %p908_p7 = pnand %p907_p6, %p901_p3 }
  0x11   :  { %911 = shalt.err (!%p908_p7)
}
  0x12   :  { %s1009_s15 = smov 128   ;;  %s1010_s16 = smov 8  }
  0x13   :  { %39 = dma.hbm_to_vmem [thread:$0]  %s1262_s2, 1024, %s34_s28, [#allocation9], %s1009_s15, %s1009_s15, %s1010_s16  }
  0x14   :  { %s1011_s19 = smov [#allocation5]   ;;  %s1012_s21 = smov [#allocation10]  }
  0x15   :  { %s24_s20 = sshll.u32 %s1011_s19, 4  ;;  %s47_s22 = sshll.u32 %s1012_s21, 4  ;;  %s25_s20 = int_to_ptr.vmem [resolvable:$true] %s24_s20  ;;  %s48_s22 = int_to_ptr.vmem [resolvable:$true] %s47_s22 }
  0x16   :  { %s912_s25 = scalar_lea.hbm %s1261_s1, 128 }
  0x17   :  { %p913_p8 = scmp.ne.s32.totalorder %s1261_s1, %s912_s25  ;;  %p916_p9 = scmp.lt.u32.totalorder %s912_s25, %s1261_s1 }
  0x19   :  { %p918_p10 = pnand %p916_p9, %p913_p8 }
  0x1b   :  { %921 = shalt.err (!%p918_p10)
}
  0x1c   :  { %s922_s2 = scalar_lea.vmem %s25_s20, 128  ;;  %p927_p12 = scmp.lt.s32.totalorder %s25_s20, %s25_s20 }
  0x1d   :  { %p923_p11 = scmp.ne.s32.totalorder %s25_s20, %s922_s2  ;;  %p928_p13 = scmp.lt.s32.totalorder %s922_s2, %s922_s2 }
  0x1f   :  { %p929_p0 = por %p928_p13, %p927_p12 }
  0x21   :  { %p930_p1 = pnand %p929_p0, %p923_p11 }
  0x23   :  { %933 = shalt.err (!%p930_p1)
}
  0x24   :  { %27 = dma.hbm_to_vmem [thread:$0]  %s1261_s1, 128, %s25_s20, [#allocation6]  }
  0x25   :  { %s934_s12 = scalar_lea.hbm %s1264_s4, 2048 }
  0x26   :  { %p935_p2 = scmp.ne.s32.totalorder %s1264_s4, %s934_s12  ;;  %p938_p3 = scmp.lt.u32.totalorder %s934_s12, %s1264_s4 }
  0x28   :  { %p940_p4 = pnand %p938_p3, %p935_p2 }
  0x2a   :  { %943 = shalt.err (!%p940_p4)
}
  0x2b   :  { %s944_s19 = scalar_lea.vmem %s48_s22, 2048  ;;  %p949_p6 = scmp.lt.s32.totalorder %s48_s22, %s48_s22 }
  0x2c   :  { %p945_p5 = scmp.ne.s32.totalorder %s48_s22, %s944_s19  ;;  %p950_p7 = scmp.lt.s32.totalorder %s944_s19, %s944_s19 }
  0x2e   :  { %p951_p8 = por %p950_p7, %p949_p6 }
  0x30   :  { %p952_p9 = pnand %p951_p8, %p945_p5 }
  0x32   :  { %955 = shalt.err (!%p952_p9)
}
  0x33   :  { %53 = dma.hbm_to_vmem [thread:$0]  %s1264_s4, 2048, %s48_s22, [#allocation9], %s1009_s15, %s1009_s15, %s1010_s16  }
  0x34   :  { %s1013_s21 = smov [#allocation11]   ;;  %s956_s26 = scalar_lea.hbm %s1266_s6, 2048 }
  0x35   :  { %s61_s23 = sshll.u32 %s1013_s21, 4  ;;  %p957_p10 = scmp.ne.s32.totalorder %s1266_s6, %s956_s26  ;;  %s62_s23 = int_to_ptr.vmem [resolvable:$true] %s61_s23 }
  0x36   :  { %p960_p11 = scmp.lt.u32.totalorder %s956_s26, %s1266_s6 }
  0x38   :  { %p962_p12 = pnand %p960_p11, %p957_p10 }
  0x3a   :  { %965 = shalt.err (!%p962_p12)
}
  0x3b   :  { %s966_s28 = scalar_lea.vmem %s62_s23, 2048  ;;  %p971_p0 = scmp.lt.s32.totalorder %s62_s23, %s62_s23 }
  0x3c   :  { %p967_p13 = scmp.ne.s32.totalorder %s62_s23, %s966_s28  ;;  %p972_p1 = scmp.lt.s32.totalorder %s966_s28, %s966_s28 }
  0x3e   :  { %p973_p2 = por %p972_p1, %p971_p0 }
  0x40   :  { %p974_p3 = pnand %p973_p2, %p967_p13 }
  0x42   :  { %977 = shalt.err (!%p974_p3)
}
  0x43   :  { %67 = dma.hbm_to_vmem [thread:$0]  %s1266_s6, 2048, %s62_s23, [#allocation12], %s1009_s15, %s1009_s15, %s1010_s16  }
  0x44   :  { %1000 = dma.done.wait [#allocation6], 128  }
  0x45   :  { %1001 = vsyncadd [#allocation6], 4294967168 }
  0x46   :  { %1002 = dma.done.wait [#allocation9], 3072  }
  0x47   :  { %1003 = vsyncadd [#allocation9], 4294964224 }
  0x48   :  { %1004 = dma.done.wait [#allocation12], 2048  }
  0x49   :  { %1005 = vsyncadd [#allocation12], 4294965248  ;;  %v1014_v0 = vmov 0.0|0.0   ;;  %vm1015_vm0 = vmmov 0   ;;  %v1016_v1 = vmov 0.0   ;;  %v1132_v2 = vld [vmem:[#allocation10] sm:$0xff] }
  0x4a   :  { %763 = vmatprep.subr.bf16.mxu0 %v1014_v0  ;;  %620 = vmatprep.mubr.msk.f32.mxu0 %vm1015_vm0, %v1016_v1  ;;  %v1134_v3 = vld [vmem:[#allocation10 + $0x8] sm:$0xff]  ;;  %v1136_v4 = vld [vmem:[#allocation10 + $0x10] sm:$0xff]  ;;  %v1138_v5 = vld [vmem:[#allocation10 + $0x18] sm:$0xff]  ;;  %vm92_vm1 = vcmask 523264   ;;  %p524_p4 = scmp.le.s32.totalorder %s1260_s0, 0 }
  0x4b   :  { %v1140_v6 = vld [vmem:[#allocation10 + $0x20] sm:$0xff]  ;;  %v1142_v7 = vld [vmem:[#allocation10 + $0x28] sm:$0xff]  ;;  %v1144_v8 = vld [vmem:[#allocation10 + $0x30] sm:$0xff]  ;;  %v776_v37 = vpack.c.bf16 (!%p524_p4), %v1134_v3, %v1132_v2  ;;  %v1017_v38 = vmov (!%p524_p4), 0.0|0.0   ;;  %v779_v39 = vpack.c.bf16 (!%p524_p4), %v1138_v5, %v1136_v4  ;;  %vm1018_vm2 = vmmov (!%p524_p4), 0  }
  0x4c   :  { %v1146_v9 = vld [vmem:[#allocation10 + $0x38] sm:$0xff]  ;;  %v1148_v10 = vld [vmem:[#allocation10 + $0x40] sm:$0xff]  ;;  %v1150_v11 = vld [vmem:[#allocation10 + $0x48] sm:$0xff]  ;;  %v1019_v40 = vmov (!%p524_p4), 0.0   ;;  %v782_v41 = vpack.c.bf16 (!%p524_p4), %v1142_v7, %v1140_v6 }
  0x4d   :  { %v1152_v12 = vld [vmem:[#allocation10 + $0x50] sm:$0xff]  ;;  %v1154_v13 = vld [vmem:[#allocation10 + $0x58] sm:$0xff]  ;;  %v1156_v14 = vld [vmem:[#allocation10 + $0x60] sm:$0xff]  ;;  %v785_v42 = vpack.c.bf16 (!%p524_p4), %v1146_v9, %v1144_v8  ;;  %v788_v43 = vpack.c.bf16 (!%p524_p4), %v1150_v11, %v1148_v10 }
  0x4e   :  { %v1158_v15 = vld [vmem:[#allocation10 + $0x68] sm:$0xff]  ;;  %v1160_v16 = vld [vmem:[#allocation10 + $0x70] sm:$0xff]  ;;  %v1162_v17 = vld [vmem:[#allocation10 + $0x78] sm:$0xff]  ;;  %v791_v44 = vpack.c.bf16 (!%p524_p4), %v1154_v13, %v1152_v12 }
  0x4f   :  { %v1167_v18 = vld [vmem:[%s1265_s5] sm:$0xff]  ;;  %v83_v19 = vld [vmem:[#allocation8] sm:$0xff]  ;;  %v84_v20 = vld [vmem:[#allocation8 + $0x8] sm:$0xff]  ;;  %v794_v45 = vpack.c.bf16 (!%p524_p4), %v1158_v15, %v1156_v14  ;;  %v797_v46 = vpack.c.bf16 (!%p524_p4), %v1162_v17, %v1160_v16 }
  0x50   :  { %v85_v21 = vld [vmem:[#allocation8 + $0x10] sm:$0xff]  ;;  %v86_v22 = vld [vmem:[#allocation8 + $0x18] sm:$0xff]  ;;  %v764_v23 = vpack.c.bf16 %v84_v20, %v83_v19  ;;  %v87_v25 = vld [vmem:[#allocation8 + $0x20] sm:$0xff] }
  0x51   :  { %v767_v24 = vpack.c.bf16 %v86_v22, %v85_v21  ;;  %v88_v26 = vld [vmem:[#allocation8 + $0x28] sm:$0xff]  ;;  %v89_v28 = vld [vmem:[#allocation8 + $0x30] sm:$0xff]  ;;  %v90_v29 = vld [vmem:[#allocation8 + $0x38] sm:$0xff] }
  0x52   :  { %765 = vmatpush3.bf16.msra.mxu0 %v764_v23  ;;  %v770_v27 = vpack.c.bf16 %v88_v26, %v87_v25  ;;  %v773_v30 = vpack.c.bf16 %v90_v29, %v89_v28  ;;  %v82_v31 = vld [vmem:[#allocation5] sm:$0xff]  ;;  %v91_v32 = vld [vmem:[%s1263_s3] sm:$0xff] }
  0x53   :  { %766 = vmatprep.subr.bf16.mxu0 %v1014_v0 }
  0x56   :  { %768 = vmatpush3.bf16.msra.mxu0 %v767_v24 }
  0x57   :  { %769 = vmatprep.subr.bf16.mxu0 %v1014_v0 }
  0x5a   :  { %771 = vmatpush3.bf16.msra.mxu0 %v770_v27 }
  0x5b   :  { %772 = vmatprep.subr.bf16.mxu0 %v1014_v0 }
  0x5e   :  { %774 = vmatpush3.bf16.msra.mxu0 %v773_v30 }
  0x5f   :  { %775 = vmatprep.subr.bf16.mxu0 (!%p524_p4), %v1017_v38 }
  0x61   :  { %621 = vmatmul.mubr.msk.f32.vlgmr.msra.gmra.mrb[0].mxu0 %vm92_vm1, %v82_v31 }
  0x62   :  { %777 = vmatpush3.bf16.msra.mxu0 (!%p524_p4), %v776_v37  ;;  %655 = vmatprep.mubr.msk.f32.mxu0 (!%p524_p4), %vm1018_vm2, %v1019_v40 }
  0x63   :  { %778 = vmatprep.subr.bf16.mxu0 (!%p524_p4), %v1017_v38 }
  0x66   :  { %780 = vmatpush3.bf16.msra.mxu0 (!%p524_p4), %v779_v39 }
  0x67   :  { %781 = vmatprep.subr.bf16.mxu0 (!%p524_p4), %v1017_v38 }
  0x6a   :  { %783 = vmatpush3.bf16.msra.mxu0 (!%p524_p4), %v782_v41 }
  0x6b   :  { %784 = vmatprep.subr.bf16.mxu0 (!%p524_p4), %v1017_v38 }
  0x6e   :  { %786 = vmatpush3.bf16.msra.mxu0 (!%p524_p4), %v785_v42 }
  0x6f   :  { %787 = vmatprep.subr.bf16.mxu0 (!%p524_p4), %v1017_v38 }
  0x72   :  { %789 = vmatpush3.bf16.msra.mxu0 (!%p524_p4), %v788_v43 }
  0x73   :  { %790 = vmatprep.subr.bf16.mxu0 (!%p524_p4), %v1017_v38 }
  0x76   :  { %792 = vmatpush3.bf16.msra.mxu0 (!%p524_p4), %v791_v44 }
  0x77   :  { %793 = vmatprep.subr.bf16.mxu0 (!%p524_p4), %v1017_v38 }
  0x7a   :  { %795 = vmatpush3.bf16.msra.mxu0 (!%p524_p4), %v794_v45 }
  0x7b   :  { %796 = vmatprep.subr.bf16.mxu0 (!%p524_p4), %v1017_v38 }
  0x7e   :  { %798 = vmatpush3.bf16.msra.mxu0 (!%p524_p4), %v797_v46 }
 0x133   :  { %189 = sbr.rel (%p524_p4) target bundleno = 538 (0x21a), region = 49 }
 0x134   :  { %v162_v33 = vpop.f32.mrb[0].mxu0 }
 0x135   :  { %v163_v34 = vadd.f32 %v162_v33, %v91_v32  ;;  %v622_v35 = vpop.f32.mrb[1].mxu0 }
 0x137   :  { %v166_v36 = vmax.f32 %v163_v34, 0.0 }
 0x139   :  { %167 = vst [vmem:[#allocation2] sm:$0xff] %v166_v36 }
 0x140   :  { %v190_v47 = vld [vmem:[#allocation2] sm:$0xff] }
 0x141   :  { %656 = vmatmul.mubr.f32.vlgmr.msra.gmra.mrb[0].mxu0 %v190_v47 }
 0x214   :  { %v257_v48 = vpop.f32.mrb[0].mxu0 }
 0x215   :  { %v258_v49 = vadd.f32 %v257_v48, %v1167_v18  ;;  %v657_v50 = vpop.f32.mrb[1].mxu0 }
 0x217   :  { %v261_v51 = vmax.f32 %v258_v49, 0.0 }
 0x219   :  { %262 = vst [vmem:[#allocation2] sm:$0xff] %v261_v51 }
 0x21a PF:  { %p525_p5 = scmp.le.s32.totalorder %s1260_s0, 1 }
 0x21b   :  { %v800_v52 = vpack.c.bf16 (!%p525_p5), %v1134_v3, %v1132_v2  ;;  %v1020_v53 = vmov (!%p525_p5), 0.0|0.0   ;;  %v803_v54 = vpack.c.bf16 (!%p525_p5), %v1138_v5, %v1136_v4  ;;  %vm1021_vm3 = vmmov (!%p525_p5), 0  }
 0x21c   :  { %266 = sbr.rel (%p525_p5) target bundleno = 789 (0x315), region = 53  ;;  %799 = vmatprep.subr.bf16.mxu0 (!%p525_p5), %v1020_v53  ;;  %v1022_v55 = vmov (!%p525_p5), 0.0   ;;  %v806_v56 = vpack.c.bf16 (!%p525_p5), %v1142_v7, %v1140_v6  ;;  %v809_v57 = vpack.c.bf16 (!%p525_p5), %v1146_v9, %v1144_v8  ;;  %v812_v58 = vpack.c.bf16 (!%p525_p5), %v1150_v11, %v1148_v10 }
 0x21d   :  { %801 = vmatpush3.bf16.msra.mxu0 (!%p525_p5), %v800_v52  ;;  %690 = vmatprep.mubr.msk.f32.mxu0 (!%p525_p5), %vm1021_vm3, %v1022_v55  ;;  %v815_v59 = vpack.c.bf16 (!%p525_p5), %v1154_v13, %v1152_v12  ;;  %v818_v60 = vpack.c.bf16 (!%p525_p5), %v1158_v15, %v1156_v14  ;;  %v821_v61 = vpack.c.bf16 (!%p525_p5), %v1162_v17, %v1160_v16 }
 0x21e   :  { %802 = vmatprep.subr.bf16.mxu0 (!%p525_p5), %v1020_v53 }
 0x220   :  { %v267_v62 = vld [vmem:[#allocation2] sm:$0xff] (!%p525_p5) }
 0x221   :  { %804 = vmatpush3.bf16.msra.mxu0 (!%p525_p5), %v803_v54 }
 0x222   :  { %805 = vmatprep.subr.bf16.mxu0 (!%p525_p5), %v1020_v53 }
 0x225   :  { %807 = vmatpush3.bf16.msra.mxu0 %v806_v56 }
 0x226   :  { %808 = vmatprep.subr.bf16.mxu0 %v1020_v53 }
 0x229   :  { %810 = vmatpush3.bf16.msra.mxu0 %v809_v57 }
 0x22a   :  { %811 = vmatprep.subr.bf16.mxu0 %v1020_v53 }
 0x22d   :  { %813 = vmatpush3.bf16.msra.mxu0 %v812_v58 }
 0x22e   :  { %814 = vmatprep.subr.bf16.mxu0 %v1020_v53 }
 0x231   :  { %816 = vmatpush3.bf16.msra.mxu0 %v815_v59 }
 0x232   :  { %817 = vmatprep.subr.bf16.mxu0 %v1020_v53 }
 0x235   :  { %819 = vmatpush3.bf16.msra.mxu0 %v818_v60 }
 0x236   :  { %820 = vmatprep.subr.bf16.mxu0 %v1020_v53 }
 0x239   :  { %822 = vmatpush3.bf16.msra.mxu0 %v821_v61 }
 0x23c   :  { %691 = vmatmul.mubr.f32.vlgmr.msra.gmra.mrb[0].mxu0 %v267_v62 }
 0x30f   :  { %v334_v63 = vpop.f32.mrb[0].mxu0 }
 0x310   :  { %v335_v19 = vadd.f32 %v334_v63, %v1167_v18  ;;  %v692_v20 = vpop.f32.mrb[1].mxu0 }
 0x312   :  { %v338_v21 = vmax.f32 %v335_v19, 0.0 }
 0x314   :  { %339 = vst [vmem:[#allocation2] sm:$0xff] %v338_v21 }
 0x315 PF:  { %p526_p6 = scmp.le.s32.totalorder %s1260_s0, 2 }
 0x316   :  { %v824_v22 = vpack.c.bf16 (!%p526_p6), %v1134_v3, %v1132_v2  ;;  %v1023_v23 = vmov (!%p526_p6), 0.0|0.0   ;;  %v827_v24 = vpack.c.bf16 (!%p526_p6), %v1138_v5, %v1136_v4  ;;  %vm1024_vm4 = vmmov (!%p526_p6), 0  }
 0x317   :  { %343 = sbr.rel (%p526_p6) target bundleno = 1040 (0x410), region = 57  ;;  %823 = vmatprep.subr.bf16.mxu0 (!%p526_p6), %v1023_v23  ;;  %v1025_v25 = vmov (!%p526_p6), 0.0   ;;  %v830_v26 = vpack.c.bf16 (!%p526_p6), %v1142_v7, %v1140_v6  ;;  %v833_v27 = vpack.c.bf16 (!%p526_p6), %v1146_v9, %v1144_v8  ;;  %v836_v2 = vpack.c.bf16 (!%p526_p6), %v1150_v11, %v1148_v10 }
 0x318   :  { %825 = vmatpush3.bf16.msra.mxu0 (!%p526_p6), %v824_v22  ;;  %725 = vmatprep.mubr.msk.f32.mxu0 (!%p526_p6), %vm1024_vm4, %v1025_v25  ;;  %v839_v3 = vpack.c.bf16 (!%p526_p6), %v1154_v13, %v1152_v12  ;;  %v842_v4 = vpack.c.bf16 (!%p526_p6), %v1158_v15, %v1156_v14  ;;  %v845_v5 = vpack.c.bf16 (!%p526_p6), %v1162_v17, %v1160_v16 }
 0x319   :  { %826 = vmatprep.subr.bf16.mxu0 (!%p526_p6), %v1023_v23 }
 0x31b   :  { %v344_v6 = vld [vmem:[#allocation2] sm:$0xff] (!%p526_p6) }
 0x31c   :  { %828 = vmatpush3.bf16.msra.mxu0 (!%p526_p6), %v827_v24 }
 0x31d   :  { %829 = vmatprep.subr.bf16.mxu0 (!%p526_p6), %v1023_v23 }
 0x320   :  { %831 = vmatpush3.bf16.msra.mxu0 %v830_v26 }
 0x321   :  { %832 = vmatprep.subr.bf16.mxu0 %v1023_v23 }
 0x324   :  { %834 = vmatpush3.bf16.msra.mxu0 %v833_v27 }
 0x325   :  { %835 = vmatprep.subr.bf16.mxu0 %v1023_v23 }
 0x328   :  { %837 = vmatpush3.bf16.msra.mxu0 %v836_v2 }
 0x329   :  { %838 = vmatprep.subr.bf16.mxu0 %v1023_v23 }
 0x32c   :  { %840 = vmatpush3.bf16.msra.mxu0 %v839_v3 }
 0x32d   :  { %841 = vmatprep.subr.bf16.mxu0 %v1023_v23 }
 0x330   :  { %843 = vmatpush3.bf16.msra.mxu0 %v842_v4 }
 0x331   :  { %844 = vmatprep.subr.bf16.mxu0 %v1023_v23 }
 0x334   :  { %846 = vmatpush3.bf16.msra.mxu0 %v845_v5 }
 0x337   :  { %726 = vmatmul.mubr.f32.vlgmr.msra.gmra.mrb[0].mxu0 %v344_v6 }
 0x40a   :  { %v411_v7 = vpop.f32.mrb[0].mxu0 }
 0x40b   :  { %v412_v8 = vadd.f32 %v411_v7, %v1167_v18  ;;  %v727_v9 = vpop.f32.mrb[1].mxu0 }
 0x40d   :  { %v415_v10 = vmax.f32 %v412_v8, 0.0 }
 0x40f   :  { %416 = vst [vmem:[#allocation2] sm:$0xff] %v415_v10 }
 0x410 PF:  { %847 = vmatprep.subr.bf16.mxu0 %v1014_v0  ;;  %v418_v11 = vld [vmem:[#allocation11] sm:$0xff]  ;;  %v419_v12 = vld [vmem:[#allocation11 + $0x8] sm:$0xff]  ;;  %v420_v13 = vld [vmem:[#allocation11 + $0x10] sm:$0xff]  ;;  %760 = vmatprep.mubr.msk.f32.mxu0 %vm1015_vm0, %v1016_v1  ;;  %s1026_s17 = smov [#allocation13]  }
 0x411   :  { %v848_v14 = vpack.c.bf16 %v419_v12, %v418_v11  ;;  %v421_v15 = vld [vmem:[#allocation11 + $0x18] sm:$0xff]  ;;  %v422_v17 = vld [vmem:[#allocation11 + $0x20] sm:$0xff]  ;;  %v423_v18 = vld [vmem:[#allocation11 + $0x28] sm:$0xff]  ;;  %s512_s18 = sshll.u32 %s1026_s17, 4  ;;  %s513_s18 = int_to_ptr.vmem [resolvable:$true] %s512_s18 }
 0x412   :  { %v851_v16 = vpack.c.bf16 %v421_v15, %v420_v13  ;;  %v854_v28 = vpack.c.bf16 %v423_v18, %v422_v17  ;;  %v424_v29 = vld [vmem:[#allocation11 + $0x30] sm:$0xff]  ;;  %v425_v30 = vld [vmem:[#allocation11 + $0x38] sm:$0xff]  ;;  %v426_v32 = vld [vmem:[#allocation11 + $0x40] sm:$0xff]  ;;  %s978_s19 = scalar_lea.vmem %s513_s18, 128  ;;  %p983_p8 = scmp.lt.s32.totalorder %s513_s18, %s513_s18 }
 0x413   :  { %849 = vmatpush3.bf16.msra.mxu0 %v848_v14  ;;  %v857_v31 = vpack.c.bf16 %v425_v30, %v424_v29  ;;  %v427_v1 = vld [vmem:[#allocation11 + $0x48] sm:$0xff]  ;;  %v428_v34 = vld [vmem:[#allocation11 + $0x50] sm:$0xff]  ;;  %v429_v35 = vld [vmem:[#allocation11 + $0x58] sm:$0xff]  ;;  %p979_p7 = scmp.ne.s32.totalorder %s513_s18, %s978_s19  ;;  %p984_p9 = scmp.lt.s32.totalorder %s978_s19, %s978_s19 }
 0x414   :  { %850 = vmatprep.subr.bf16.mxu0 %v1014_v0  ;;  %v860_v33 = vpack.c.bf16 %v427_v1, %v426_v32  ;;  %v863_v36 = vpack.c.bf16 %v429_v35, %v428_v34  ;;  %v430_v37 = vld [vmem:[#allocation11 + $0x60] sm:$0xff]  ;;  %v431_v38 = vld [vmem:[#allocation11 + $0x68] sm:$0xff]  ;;  %v432_v40 = vld [vmem:[#allocation11 + $0x70] sm:$0xff] }
 0x415   :  { %v866_v39 = vpack.c.bf16 %v431_v38, %v430_v37  ;;  %v433_v41 = vld [vmem:[#allocation11 + $0x78] sm:$0xff]  ;;  %v434_v44 = vld [vmem:[%s1267_s7] sm:$0xff]  ;;  %p985_p10 = por %p984_p9, %p983_p8 }
 0x416   :  { %v869_v42 = vpack.c.bf16 %v433_v41, %v432_v40  ;;  %v417_v43 = vld [vmem:[#allocation2] sm:$0xff] }
 0x417   :  { %852 = vmatpush3.bf16.msra.mxu0 %v851_v16  ;;  %p986_p11 = pnand %p985_p10, %p979_p7 }
 0x418   :  { %853 = vmatprep.subr.bf16.mxu0 %v1014_v0 }
 0x41b   :  { %855 = vmatpush3.bf16.msra.mxu0 %v854_v28 }
 0x41c   :  { %856 = vmatprep.subr.bf16.mxu0 %v1014_v0 }
 0x41f   :  { %858 = vmatpush3.bf16.msra.mxu0 %v857_v31 }
 0x420   :  { %859 = vmatprep.subr.bf16.mxu0 %v1014_v0 }
 0x423   :  { %861 = vmatpush3.bf16.msra.mxu0 %v860_v33 }
 0x424   :  { %862 = vmatprep.subr.bf16.mxu0 %v1014_v0 }
 0x427   :  { %864 = vmatpush3.bf16.msra.mxu0 %v863_v36 }
 0x428   :  { %865 = vmatprep.subr.bf16.mxu0 %v1014_v0 }
 0x42b   :  { %867 = vmatpush3.bf16.msra.mxu0 %v866_v39 }
 0x42c   :  { %868 = vmatprep.subr.bf16.mxu0 %v1014_v0 }
 0x42f   :  { %870 = vmatpush3.bf16.msra.mxu0 %v869_v42 }
 0x432   :  { %761 = vmatmul.mubr.f32.vlgmr.msra.gmra.mrb[0].mxu0 %v417_v43 }
 0x505   :  { %v501_v45 = vpop.f32.mrb[0].mxu0 }
 0x506   :  { %v502_v46 = vadd.f32 %v501_v45, %v434_v44  ;;  %v762_v47 = vpop.f32.mrb[1].mxu0 }
 0x508   :  { %505 = vst [vmem:[#allocation13] sm:$0xff] %v502_v46 }
 0x509   :  { %989 = shalt.err (!%p986_p11)
}
 0x50a   :  { %s990_s21 = scalar_lea.hbm %s1268_s8, 128 }
 0x50b   :  { %p991_p12 = scmp.ne.s32.totalorder %s1268_s8, %s990_s21  ;;  %p994_p13 = scmp.lt.u32.totalorder %s990_s21, %s1268_s8 }
 0x50d   :  { %p996_p0 = pnand %p994_p13, %p991_p12 }
 0x50f   :  { %999 = shalt.err (!%p996_p0)
}
 0x510   :  { %515 = dma.vmem_to_hbm [thread:$0]  %s513_s18, 128, %s1268_s8, [#allocation7]  }
 0x511   :  { %1006 = dma.done.wait [#allocation7], 128  }
 0x512   :  { %1007 = vsyncadd [#allocation7], 4294967168 }
 0x513   :  { %519 = vsyncpa [#allocation6], 1 }
 0x514   :  { %520 = vsyncpa [#allocation9], 1 }
 0x515   :  { %521 = vsyncpa [#allocation12], 1 }
 0x516   :  { %522 = vsyncpa [#allocation7], 1 }

</bundles_post_ra>
